<compile_context>
chip_gen: v7x
topology: tpu7x:2x2x1
jax: 0.10.0
libtpu: 0.0.40
codegen_flags: <defaults>
</compile_context>

<pallas_src>
import functools

import numpy as np
import jax
import jax.numpy as jnp
from jax.experimental import pallas as pl
from jax.experimental.pallas import tpu as pltpu


def _dino_loss_kernel(params_ref, teacher_hbm, student_ref, center_ref,
                      loss_ref, qsum_ref,
                      q_vmem, qboth_vmem, acc_ref, dma_sem,
                      *, batch, n_loss_terms):
    j = pl.program_id(0)              # student crop index
    ncrops = pl.num_programs(0)

    inv_s_temp = params_ref[0]        # 1 / student_temp
    inv_t_temp = params_ref[1]        # 1 / teacher_temp

    # --- per crop: student log-softmax pieces, computed exactly once ---
    v = student_ref[...].astype(jnp.float32) * inv_s_temp            # (B, D)
    v = v - jnp.max(v, axis=-1, keepdims=True)
    lse = jnp.log(jnp.sum(jnp.exp(v), axis=-1, keepdims=True))       # (B, 1)

    # --- grid step 0 only: DMA teacher once, softmax in place, keep resident ---
    @pl.when(j == 0)
    def _init():
        cp = pltpu.make_async_copy(teacher_hbm, q_vmem, dma_sem.at[0])
        cp.start()
        cp.wait()
        t = (q_vmem[...].astype(jnp.float32) - center_ref[...]) * inv_t_temp
        t = t - jnp.max(t, axis=-1, keepdims=True)
        et = jnp.exp(t)                                              # (2B, D)
        # Column reciprocal + wide multiply instead of a wide divide.
        inv_rowsum = pl.reciprocal(jnp.sum(et, axis=-1, keepdims=True),
                                   approx=False)                    # (2B, 1)
        q = et * inv_rowsum                                          # (2B, D) f32
        q_vmem[...] = q.astype(q_vmem.dtype)
        qboth = q[0:batch] + q[batch:2 * batch]                      # (B, D)
        qboth_vmem[...] = qboth.astype(qboth_vmem.dtype)
        # Row-sum of teacher probabilities, reused for the center EMA update
        # (lane-dense (1, D) output; avoids recomputing softmax in XLA).
        qsum_ref[...] = jnp.sum(qboth, axis=0, keepdims=True)
        # Crop 0 pairs only with teacher chunk 1:
        #   sum_d(-q * logp) == lse - sum_d(q * v_shifted)   (sum_d q == 1)
        dot = jnp.sum(q[batch:2 * batch] * v, axis=-1, keepdims=True)
        acc_ref[...] = lse - dot                                     # init accumulator

    @pl.when(j == 1)
    def _crop1():
        # Crop 1 pairs only with teacher chunk 0.
        qi = q_vmem[pl.ds(0, batch), :].astype(jnp.float32)
        dot = jnp.sum(qi * v, axis=-1, keepdims=True)
        acc_ref[...] += lse - dot

    @pl.when(j >= 2)
    def _both_chunks():
        # Crops >= 2 pair with BOTH teacher chunks: one fused multiply +
        # one lane reduce using qboth = q0 + q1, and 2*lse - dot.
        qb = qboth_vmem[...].astype(jnp.float32)
        dot = jnp.sum(qb * v, axis=-1, keepdims=True)
        acc_ref[...] += 2.0 * lse - dot

    @pl.when(j == ncrops - 1)
    def _finalize():
        scale = jnp.float32(1.0 / (batch * n_loss_terms))
        loss_ref[...] = jnp.sum(acc_ref[...], axis=0, keepdims=True) * scale


def dino_loss_pallas(student_pred, teacher_pred, center, *,
                     ncrops, student_temp, teacher_temp):
    """Returns (scalar DINO loss, row-sum of teacher softmax probabilities)."""
    rows_s, D = student_pred.shape
    rows_t, Dt = teacher_pred.shape
    assert D == Dt and rows_s % ncrops == 0 and rows_t % 2 == 0
    assert ncrops >= 2, "need at least 2 crops for a non-empty loss"
    B = rows_s // ncrops
    assert rows_t == 2 * B, "teacher must hold 2 crops of the same batch"
    n_loss_terms = 2 * ncrops - 2

    params = jnp.array([1.0 / student_temp, 1.0 / teacher_temp],
                       dtype=jnp.float32)
    kernel = functools.partial(_dino_loss_kernel, batch=B,
                               n_loss_terms=float(n_loss_terms))

    loss, qsum = pl.pallas_call(
        kernel,
        out_shape=(jax.ShapeDtypeStruct((1, 1), jnp.float32),
                   jax.ShapeDtypeStruct((1, D), jnp.float32)),
        grid=(ncrops,),
        in_specs=[
            pl.BlockSpec(memory_space=pltpu.MemorySpace.SMEM),   # [1/s_t, 1/t_t]
            pl.BlockSpec(memory_space=pl.ANY),                   # teacher (raw HBM)
            pl.BlockSpec((B, D), lambda j: (j, 0)),              # student crop j
            pl.BlockSpec((1, D), lambda j: (0, 0)),              # center, resident
        ],
        out_specs=(
            pl.BlockSpec((1, 1), lambda j: (0, 0)),              # loss (finalize only)
            pl.BlockSpec((1, D), lambda j: (0, 0)),              # teacher prob row-sum
        ),
        scratch_shapes=[
            pltpu.VMEM((2 * B, D), teacher_pred.dtype),   # resident teacher probs
            pltpu.VMEM((B, D), teacher_pred.dtype),       # q0 + q1 (fused-pair path)
            pltpu.VMEM((B, 1), jnp.float32),              # per-row loss accumulator
            pltpu.SemaphoreType.DMA((1,)),                # teacher DMA completion
        ],
        compiler_params=pltpu.CompilerParams(
            dimension_semantics=("arbitrary",)),
    )(params, teacher_pred, student_pred, center)
    return loss[0, 0], qsum


class DINOLossPallas:
    """JAX/Pallas port of the PyTorch DINOLoss module (forward pass)."""

    def __init__(self, out_dim, ncrops, warmup_teacher_temp, teacher_temp,
                 warmup_teacher_epochs, nepochs, student_temp=0.1,
                 center_momentum=0.9):
        self.out_dim = out_dim
        self.ncrops = ncrops
        self.student_temp = student_temp
        self.center_momentum = center_momentum
        # Buffer init: torch.zeros(1, out_dim)
        self.center = jnp.zeros((1, out_dim), dtype=jnp.float32)
        self.teacher_temp_schedule = np.concatenate((
            np.linspace(warmup_teacher_temp, teacher_temp, warmup_teacher_epochs),
            np.ones(nepochs - warmup_teacher_epochs) * teacher_temp))

    def __call__(self, student_pred, teacher_pred, epoch):
        temp = float(self.teacher_temp_schedule[epoch])
        loss, teacher_prob_rowsum = dino_loss_pallas(
            student_pred, teacher_pred, self.center,
            ncrops=self.ncrops,
            student_temp=self.student_temp,
            teacher_temp=temp)
        # update_center(): the spec passes the *softmaxed* teacher chunks, so
        # batch_center = (sum over both chunks' rows) / len(chunks) == 2.
        # TODO(synk): canonical DINO sums RAW teacher logits / (2B*world_size);
        # the spec as written calls torch.sum on a tuple of softmaxed chunks,
        # which is ill-defined in PyTorch — we implement the concat-rows /
        # num_chunks interpretation. dist.all_reduce / dist.get_world_size
        # have no single-device Pallas equivalent; assume world_size == 1.
        batch_center = teacher_prob_rowsum / 2.0
        self.center = (self.center * self.center_momentum
                       + batch_center * (1.0 - self.center_momentum))
        return loss


def _dino_loss_ref(student_pred, teacher_pred, center, *,
                   ncrops, student_temp, teacher_temp):
    """Pure-JAX reference mirroring the PyTorch forward exactly."""
    s_chunks = jnp.split(student_pred / student_temp, ncrops, axis=0)
    q = jax.nn.softmax((teacher_pred - center) / teacher_temp, axis=-1)
    q_chunks = jnp.split(q, 2, axis=0)
    total, n = 0.0, 0
    for i, qq in enumerate(q_chunks):
        for j, v in enumerate(s_chunks):
            if j == i:
                continue
            loss = jnp.sum(-qq * jax.nn.log_softmax(v, axis=-1), axis=-1)
            total = total + loss.mean()
            n += 1
    return total / n


if __name__ == "__main__":
    # Small, module-consistent shapes:
    #   out_dim D = 128, ncrops = 4, per-crop batch B = 8
    #   student_pred: (ncrops*B, D) = (32, 128)
    #   teacher_pred: (2*B, D)      = (16, 128)
    # NOTE: at these shapes per-grid-step pipeline overhead dominates; do not
    # treat this configuration as a performance benchmark.
    out_dim, ncrops, B = 128, 4, 8
    epoch = 5

    key = jax.random.PRNGKey(0)
    k1, k2 = jax.random.split(key)
    student_pred = jax.random.normal(k1, (ncrops * B, out_dim), jnp.float32)
    teacher_pred = jax.random.normal(k2, (2 * B, out_dim), jnp.float32)

    loss_mod = DINOLossPallas(out_dim=out_dim, ncrops=ncrops,
                              warmup_teacher_temp=0.04, teacher_temp=0.07,
                              warmup_teacher_epochs=3, nepochs=10)

    loss = loss_mod(student_pred, teacher_pred, epoch)
    loss = jax.block_until_ready(loss)
    center_after = jax.block_until_ready(loss_mod.center)

    # Correctness check against a pure-JAX reference of the same math.
    t_temp = float(loss_mod.teacher_temp_schedule[epoch])
    zero_center = jnp.zeros((1, out_dim), jnp.float32)
    ref_loss = _dino_loss_ref(student_pred, teacher_pred, zero_center,
                              ncrops=ncrops, student_temp=0.1,
                              teacher_temp=t_temp)
    ref_loss = jax.block_until_ready(ref_loss)
    np.testing.assert_allclose(np.asarray(loss), np.asarray(ref_loss),
                               rtol=1e-5, atol=1e-5)

    # Check the fused center update against the reference interpretation.
    ref_probs = jax.nn.softmax((teacher_pred - zero_center) / t_temp, axis=-1)
    ref_center = (zero_center * 0.9
                  + (jnp.sum(ref_probs, axis=0, keepdims=True) / 2.0) * 0.1)
    np.testing.assert_allclose(np.asarray(center_after), np.asarray(ref_center),
                               rtol=1e-5, atol=1e-5)

    print("KERNEL_OK")
</pallas_src>

<mosaic_0001>
module attributes {stable_mosaic.version = 11 : i64} {
  func.func @_dino_loss_kernel(%arg0: i32, %arg1: memref<2xf32, #tpu.memory_space<smem>>, %arg2: memref<16x128xf32, #tpu.memory_space<any>>, %arg3: memref<8x128xf32, #tpu.memory_space<vmem>>, %arg4: memref<1x128xf32, #tpu.memory_space<vmem>>, %arg5: memref<1x1xf32, #tpu.memory_space<vmem>>, %arg6: memref<1x128xf32, #tpu.memory_space<vmem>>, %arg7: memref<16x128xf32, #tpu.memory_space<vmem>>, %arg8: memref<8x128xf32, #tpu.memory_space<vmem>>, %arg9: memref<8x1xf32, #tpu.memory_space<vmem>>, %arg10: memref<1x!tpu.dma_semaphore, #tpu.memory_space<semaphore_mem>>) attributes {dimension_semantics = [#tpu.dimension_semantics<arbitrary>], iteration_bounds = array<i64: 4>, scalar_prefetch = 0 : i64, scratch_operands = 4 : i64, tpu.core_type = #tpu.core_type<tc>, window_params = [{transform_indices = @transform_0, window_bounds = array<i64: 2>}, {}, {transform_indices = @transform_2, window_bounds = array<i64: 8, 128>}, {pipeline_mode = #tpu.pipeline_mode<synchronous>, transform_indices = @transform_3, window_bounds = array<i64: 1, 128>}, {pipeline_mode = #tpu.pipeline_mode<synchronous>, transform_indices = @transform_4, window_bounds = array<i64: 1, 1>}, {pipeline_mode = #tpu.pipeline_mode<synchronous>, transform_indices = @transform_5, window_bounds = array<i64: 1, 128>}]} {
    %c0 = arith.constant 0 : index
    %0 = memref.load %arg1[%c0] : memref<2xf32, #tpu.memory_space<smem>>
    %c1 = arith.constant 1 : index
    %1 = memref.load %arg1[%c1] : memref<2xf32, #tpu.memory_space<smem>>
    %c0_0 = arith.constant 0 : index
    %c0_1 = arith.constant 0 : index
    %2 = vector.load %arg3[%c0_0, %c0_1] : memref<8x128xf32, #tpu.memory_space<vmem>>, vector<8x128xf32>
    %3 = vector.broadcast %0 : f32 to vector<8x128xf32>
    %4 = arith.mulf %2, %3 : vector<8x128xf32>
    %cst = arith.constant dense<0xFF800000> : vector<8xf32>
    %5 = vector.multi_reduction <maximumf>, %4, %cst [1] : vector<8x128xf32> to vector<8xf32>
    %6 = vector.shape_cast %5 : vector<8xf32> to vector<8x1xf32>
    %7 = vector.broadcast %6 : vector<8x1xf32> to vector<8x128xf32>
    %8 = arith.subf %4, %7 : vector<8x128xf32>
    %9 = math.exp %8 : vector<8x128xf32>
    %cst_2 = arith.constant dense<0.000000e+00> : vector<8xf32>
    %10 = vector.multi_reduction <add>, %9, %cst_2 [1] : vector<8x128xf32> to vector<8xf32>
    %11 = vector.shape_cast %10 : vector<8xf32> to vector<8x1xf32>
    %12 = math.log %11 : vector<8x1xf32>
    %c0_i32 = arith.constant 0 : i32
    %13 = arith.cmpi eq, %arg0, %c0_i32 : i32
    %14 = arith.extui %13 : i1 to i32
    %c0_i32_3 = arith.constant 0 : i32
    %15 = arith.cmpi ne, %14, %c0_i32_3 : i32
    scf.if %15 {
      %c0_i32_7 = arith.constant 0 : i32
      %25 = tpu.memref_slice %arg10[%c0_i32_7] : memref<1x!tpu.dma_semaphore, #tpu.memory_space<semaphore_mem>> -> memref<1x!tpu.dma_semaphore, #tpu.memory_space<semaphore_mem>>
      %26 = tpu.memref_squeeze %25 : memref<1x!tpu.dma_semaphore, #tpu.memory_space<semaphore_mem>> -> memref<!tpu.dma_semaphore, #tpu.memory_space<semaphore_mem>>
      tpu.enqueue_dma source(%arg2 : memref<16x128xf32, #tpu.memory_space<any>>) target(%arg7 : memref<16x128xf32, #tpu.memory_space<vmem>>) target_semaphore(%26 : memref<!tpu.dma_semaphore, #tpu.memory_space<semaphore_mem>>)
      %c0_i32_8 = arith.constant 0 : i32
      %27 = tpu.memref_slice %arg10[%c0_i32_8] : memref<1x!tpu.dma_semaphore, #tpu.memory_space<semaphore_mem>> -> memref<1x!tpu.dma_semaphore, #tpu.memory_space<semaphore_mem>>
      %28 = tpu.memref_squeeze %27 : memref<1x!tpu.dma_semaphore, #tpu.memory_space<semaphore_mem>> -> memref<!tpu.dma_semaphore, #tpu.memory_space<semaphore_mem>>
      tpu.wait_dma2 semaphore(%28 : memref<!tpu.dma_semaphore, #tpu.memory_space<semaphore_mem>>) src(%arg2 : memref<16x128xf32, #tpu.memory_space<any>>) dst(%arg7 : memref<16x128xf32, #tpu.memory_space<vmem>>)
      %c0_9 = arith.constant 0 : index
      %c0_10 = arith.constant 0 : index
      %29 = vector.load %arg7[%c0_9, %c0_10] : memref<16x128xf32, #tpu.memory_space<vmem>>, vector<16x128xf32>
      %c0_11 = arith.constant 0 : index
      %c0_12 = arith.constant 0 : index
      %30 = vector.load %arg4[%c0_11, %c0_12] : memref<1x128xf32, #tpu.memory_space<vmem>>, vector<1x128xf32>
      %31 = vector.broadcast %30 : vector<1x128xf32> to vector<16x128xf32>
      %32 = arith.subf %29, %31 : vector<16x128xf32>
      %33 = vector.broadcast %1 : f32 to vector<16x128xf32>
      %34 = arith.mulf %32, %33 : vector<16x128xf32>
      %cst_13 = arith.constant dense<0xFF800000> : vector<16xf32>
      %35 = vector.multi_reduction <maximumf>, %34, %cst_13 [1] : vector<16x128xf32> to vector<16xf32>
      %36 = vector.shape_cast %35 : vector<16xf32> to vector<16x1xf32>
      %37 = vector.broadcast %36 : vector<16x1xf32> to vector<16x128xf32>
      %38 = arith.subf %34, %37 : vector<16x128xf32>
      %39 = math.exp %38 : vector<16x128xf32>
      %cst_14 = arith.constant dense<0.000000e+00> : vector<16xf32>
      %40 = vector.multi_reduction <add>, %39, %cst_14 [1] : vector<16x128xf32> to vector<16xf32>
      %41 = vector.shape_cast %40 : vector<16xf32> to vector<16x1xf32>
      %42 = tpu.reciprocal %41 : vector<16x1xf32> -> vector<16x1xf32>
      %43 = vector.broadcast %42 : vector<16x1xf32> to vector<16x128xf32>
      %44 = arith.mulf %39, %43 : vector<16x128xf32>
      %c0_15 = arith.constant 0 : index
      %c0_16 = arith.constant 0 : index
      %45 = vector.load %arg7[%c0_15, %c0_16] : memref<16x128xf32, #tpu.memory_space<vmem>>, vector<16x128xf32>
      tpu.vector_store %arg7[%c0_15, %c0_16], %44 {strides = array<i32>} : memref<16x128xf32, #tpu.memory_space<vmem>>, vector<16x128xf32>,
      %46 = vector.extract_strided_slice %44 {offsets = [0, 0], sizes = [8, 128], strides = [1, 1]} : vector<16x128xf32> to vector<8x128xf32>
      %47 = vector.extract_strided_slice %44 {offsets = [8, 0], sizes = [8, 128], strides = [1, 1]} : vector<16x128xf32> to vector<8x128xf32>
      %48 = arith.addf %46, %47 : vector<8x128xf32>
      %c0_17 = arith.constant 0 : index
      %c0_18 = arith.constant 0 : index
      %49 = vector.load %arg8[%c0_17, %c0_18] : memref<8x128xf32, #tpu.memory_space<vmem>>, vector<8x128xf32>
      tpu.vector_store %arg8[%c0_17, %c0_18], %48 {strides = array<i32>} : memref<8x128xf32, #tpu.memory_space<vmem>>, vector<8x128xf32>,
      %cst_19 = arith.constant dense<0.000000e+00> : vector<128xf32>
      %50 = vector.multi_reduction <add>, %48, %cst_19 [0] : vector<8x128xf32> to vector<128xf32>
      %51 = vector.shape_cast %50 : vector<128xf32> to vector<1x128xf32>
      %c0_20 = arith.constant 0 : index
      %c0_21 = arith.constant 0 : index
      %52 = vector.load %arg6[%c0_20, %c0_21] : memref<1x128xf32, #tpu.memory_space<vmem>>, vector<1x128xf32>
      tpu.vector_store %arg6[%c0_20, %c0_21], %51 {strides = array<i32>} : memref<1x128xf32, #tpu.memory_space<vmem>>, vector<1x128xf32>,
      %53 = vector.extract_strided_slice %44 {offsets = [8, 0], sizes = [8, 128], strides = [1, 1]} : vector<16x128xf32> to vector<8x128xf32>
      %54 = arith.mulf %53, %8 : vector<8x128xf32>
      %cst_22 = arith.constant dense<0.000000e+00> : vector<8xf32>
      %55 = vector.multi_reduction <add>, %54, %cst_22 [1] : vector<8x128xf32> to vector<8xf32>
      %56 = vector.shape_cast %55 : vector<8xf32> to vector<8x1xf32>
      %57 = arith.subf %12, %56 : vector<8x1xf32>
      %c0_23 = arith.constant 0 : index
      %c0_24 = arith.constant 0 : index
      %58 = vector.load %arg9[%c0_23, %c0_24] : memref<8x1xf32, #tpu.memory_space<vmem>>, vector<8x1xf32>
      tpu.vector_store %arg9[%c0_23, %c0_24], %57 {strides = array<i32>} : memref<8x1xf32, #tpu.memory_space<vmem>>, vector<8x1xf32>,
    } else {
    }
    %c1_i32 = arith.constant 1 : i32
    %16 = arith.cmpi eq, %arg0, %c1_i32 : i32
    %17 = arith.extui %16 : i1 to i32
    %c0_i32_4 = arith.constant 0 : i32
    %18 = arith.cmpi ne, %17, %c0_i32_4 : i32
    scf.if %18 {
      %c0_7 = arith.constant 0 : index
      %c0_8 = arith.constant 0 : index
      %25 = vector.load %arg7[%c0_7, %c0_8] : memref<16x128xf32, #tpu.memory_space<vmem>>, vector<8x128xf32>
      %26 = arith.mulf %25, %8 : vector<8x128xf32>
      %cst_9 = arith.constant dense<0.000000e+00> : vector<8xf32>
      %27 = vector.multi_reduction <add>, %26, %cst_9 [1] : vector<8x128xf32> to vector<8xf32>
      %28 = vector.shape_cast %27 : vector<8xf32> to vector<8x1xf32>
      %c0_10 = arith.constant 0 : index
      %c0_11 = arith.constant 0 : index
      %29 = vector.load %arg9[%c0_10, %c0_11] : memref<8x1xf32, #tpu.memory_space<vmem>>, vector<8x1xf32>
      %30 = arith.subf %12, %28 : vector<8x1xf32>
      %31 = arith.addf %29, %30 : vector<8x1xf32>
      %c0_12 = arith.constant 0 : index
      %c0_13 = arith.constant 0 : index
      %32 = vector.load %arg9[%c0_12, %c0_13] : memref<8x1xf32, #tpu.memory_space<vmem>>, vector<8x1xf32>
      tpu.vector_store %arg9[%c0_12, %c0_13], %31 {strides = array<i32>} : memref<8x1xf32, #tpu.memory_space<vmem>>, vector<8x1xf32>,
    } else {
    }
    %c2_i32 = arith.constant 2 : i32
    %19 = arith.cmpi sge, %arg0, %c2_i32 : i32
    %20 = arith.extui %19 : i1 to i32
    %c0_i32_5 = arith.constant 0 : i32
    %21 = arith.cmpi ne, %20, %c0_i32_5 : i32
    scf.if %21 {
      %c0_7 = arith.constant 0 : index
      %c0_8 = arith.constant 0 : index
      %25 = vector.load %arg8[%c0_7, %c0_8] : memref<8x128xf32, #tpu.memory_space<vmem>>, vector<8x128xf32>
      %26 = arith.mulf %25, %8 : vector<8x128xf32>
      %cst_9 = arith.constant dense<0.000000e+00> : vector<8xf32>
      %27 = vector.multi_reduction <add>, %26, %cst_9 [1] : vector<8x128xf32> to vector<8xf32>
      %28 = vector.shape_cast %27 : vector<8xf32> to vector<8x1xf32>
      %c0_10 = arith.constant 0 : index
      %c0_11 = arith.constant 0 : index
      %29 = vector.load %arg9[%c0_10, %c0_11] : memref<8x1xf32, #tpu.memory_space<vmem>>, vector<8x1xf32>
      %cst_12 = arith.constant 2.000000e+00 : f32
      %30 = vector.broadcast %cst_12 : f32 to vector<8x1xf32>
      %31 = arith.mulf %30, %12 : vector<8x1xf32>
      %32 = arith.subf %31, %28 : vector<8x1xf32>
      %33 = arith.addf %29, %32 : vector<8x1xf32>
      %c0_13 = arith.constant 0 : index
      %c0_14 = arith.constant 0 : index
      %34 = vector.load %arg9[%c0_13, %c0_14] : memref<8x1xf32, #tpu.memory_space<vmem>>, vector<8x1xf32>
      tpu.vector_store %arg9[%c0_13, %c0_14], %33 {strides = array<i32>} : memref<8x1xf32, #tpu.memory_space<vmem>>, vector<8x1xf32>,
    } else {
    }
    %c3_i32 = arith.constant 3 : i32
    %22 = arith.cmpi eq, %arg0, %c3_i32 : i32
    %23 = arith.extui %22 : i1 to i32
    %c0_i32_6 = arith.constant 0 : i32
    %24 = arith.cmpi ne, %23, %c0_i32_6 : i32
    scf.if %24 {
      %c0_7 = arith.constant 0 : index
      %c0_8 = arith.constant 0 : index
      %25 = vector.load %arg9[%c0_7, %c0_8] : memref<8x1xf32, #tpu.memory_space<vmem>>, vector<8x1xf32>
      %cst_9 = arith.constant dense<0.000000e+00> : vector<1xf32>
      %26 = vector.multi_reduction <add>, %25, %cst_9 [0] : vector<8x1xf32> to vector<1xf32>
      %27 = vector.shape_cast %26 : vector<1xf32> to vector<1x1xf32>
      %cst_10 = arith.constant 0.020833334 : f32
      %28 = vector.broadcast %cst_10 : f32 to vector<1x1xf32>
      %29 = arith.mulf %27, %28 : vector<1x1xf32>
      %c0_11 = arith.constant 0 : index
      %c0_12 = arith.constant 0 : index
      %30 = vector.load %arg5[%c0_11, %c0_12] : memref<1x1xf32, #tpu.memory_space<vmem>>, vector<1x1xf32>
      tpu.vector_store %arg5[%c0_11, %c0_12], %29 {strides = array<i32>} : memref<1x1xf32, #tpu.memory_space<vmem>>, vector<1x1xf32>,
    } else {
    }
    return
  }
  func.func @transform_0(%arg0: i32) -> i32 {
    %c0_i32 = arith.constant 0 : i32
    %c0_i32_0 = arith.constant 0 : i32
    return %c0_i32 : i32
  }
  func.func @transform_2(%arg0: i32) -> (i32, i32) {
    %c0_i32 = arith.constant 0 : i32
    %c0_i32_0 = arith.constant 0 : i32
    return %arg0, %c0_i32 : i32, i32
  }
  func.func @transform_3(%arg0: i32) -> (i32, i32) {
    %c0_i32 = arith.constant 0 : i32
    %c0_i32_0 = arith.constant 0 : i32
    %c0_i32_1 = arith.constant 0 : i32
    return %c0_i32, %c0_i32_0 : i32, i32
  }
  func.func @transform_4(%arg0: i32) -> (i32, i32) {
    %c0_i32 = arith.constant 0 : i32
    %c0_i32_0 = arith.constant 0 : i32
    %c0_i32_1 = arith.constant 0 : i32
    return %c0_i32, %c0_i32_0 : i32, i32
  }
  func.func @transform_5(%arg0: i32) -> (i32, i32) {
    %c0_i32 = arith.constant 0 : i32
    %c0_i32_0 = arith.constant 0 : i32
    %c0_i32_1 = arith.constant 0 : i32
    return %c0_i32, %c0_i32_0 : i32, i32
  }
}

</mosaic_0001>

<bundles_post_ra>
// kernel: tpu_custom_call.1
= control target key start
LH: loop header
LB: loop body
LE: loop exit
PB: predicated region body
PF: predicated region fallthrough
CT: control target
= control target key end

     0   :  { %11 = vsyncpa [#allocation9], 0  ;;  %s962_s0 = inlined_call_operand.hbm [shape: f32[2], index: 0, kind: input, shape index: {}]   ;;  %s963_s1 = inlined_call_operand.hbm [shape: f32[16,128], index: 1, kind: input, shape index: {}]   ;;  %s964_s2 = inlined_call_operand.hbm [shape: f32[32,128], index: 2, kind: input, shape index: {}]   ;;  %s965_s3 = inlined_call_operand.vmem [shape: f32[1,128], index: 3, kind: input, shape index: {}]   ;;  %s966_s4 = inlined_call_operand.hbm [shape: f32[1,1], index: 4, kind: output, shape index: {0}]   ;;  %s967_s5 = inlined_call_operand.hbm [shape: f32[1,128], index: 5, kind: output, shape index: {1}]  }
   0x1   :  { %12 = vsyncpa [#allocation7], 0 }
   0x2   :  { %14 = vsyncpa [#allocation7 + $0x1], 0 }
   0x3   :  { %15 = vsyncpa [#allocation8], 0 }
   0x4   :  { %16 = vsyncpa [#allocation13], 0  ;;  %s735_s18 = smov 0   ;;  %s737_s19 = smov 0  }
   0x5   :  { %s739_s20 = smov 0   ;;  %s741_s21 = smov 0  }
   0x6 LB: > { %s754_s22 = sadd.s32 4294967295, %s698_s21   ;;  %p63_p0 = scmp.ne.s32.totalorder %s690_s19, %s686_s18  ;;  %s698_s21 = sphi %s741_s21, %s982_s21   ;;  %s694_s20 = sphi %s739_s20, %s981_s20   ;;  %s690_s19 = sphi %s737_s19, %s980_s19   ;;  %s686_s18 = sphi %s735_s18, %s979_s18  }
   0x7   : > { %p968_p1 = scmp.eq.s32.totalorder %s754_s22, 0  ;;  %p435_p2 = scmp.ge.s32.totalorder %s698_s21, 1 }
   0x8   : > { %p137_p3 = scmp.lt.s32.totalorder %s698_s21, 5  ;;  %s772_s25 = sadd.s32 1, %s698_s21  }
   0x9   : > { %p763_p5 = por %p968_p1, %p63_p0  ;;  %s47_s26 = ssub.s32 %s698_s21, %s772_s25 }
   0xa   : > { %p767_p6 = pnand %p435_p2, %p137_p3  ;;  %s50_s27 = sadd.s32 1, %s694_s20 }
   0xb   : > { %s970_s23 = scalar_select %p763_p5, 1, 0 }
   0xc   : > { %p470_p7 = pneg %p767_p6  ;;  %p785_p9 = scmp.eq.s32.totalorder %s47_s26, 0 }
   0xd   : > { %p57_p10 = scmp.ne.s32.totalorder %s694_s20, %s690_s19  ;;  %p58_p11 = scmp.eq.s32.totalorder %s698_s21, 0 }
   0xe   : > { %p781_p8 = pnand %p470_p7, %p968_p1  ;;  %p479_p12 = scmp.lt.s32.totalorder %s698_s21, 4 }
   0xf   : > { %s533_s7 = scalar_lea.hbm %s962_s0, 16 }
  0x10   : > { %p534_p13 = scmp.ne.s32.totalorder %s962_s0, %s533_s7  ;;  %p535_p0 = pneg %p781_p8 }
  0x11   : > { %p540_p7 = scmp.lt.u32.totalorder %s533_s7, %s962_s0 }
  0x12   : > { %p536_p2 = pnand %p535_p0, %p534_p13 }
  0x14   : > { %p537_p3 = pneg %p536_p2 }
  0x16   : > { %p542_p4 = pnand %p540_p7, %p537_p3 }
  0x18   : > { %545 = shalt.err (!%p542_p4)
}
  0x19   : > { %s700_s12 = smov [#allocation6]   ;;  %p59_p4 = por %p58_p11, %p57_p10 }
  0x1a   : > { %473 = dma.hbm_to_smem (!%p781_p8), %s962_s0, 16, %s700_s12, [#allocation9]  }
  0x1b   : > { %s812_s15 = scalar_select %p785_p9, %s694_s20, %s50_s27  }
  0x1c   : > { %s162_s16 = sand.u32 1, %s694_s20   ;;  %s439_s18 = sshll.u32 %s698_s21, 7 }
  0x1d   : > { %s438_s17 = sshll.u32 %s162_s16, 3  ;;  %s824_s30 = scalar_lea.hbm %s964_s2, %s439_s18 }
  0x1e   : > { %s166_s6 = scalar_lea.vmem [#allocation10], %s438_s17  ;;  %p830_p8 = pnand %p479_p12, %p59_p4 }
  0x1f   : > { %s173_s7 = sshll.u32 %s166_s6, 4  ;;  %s163_s29 = scalar_lea.sflag [#allocation7], %s162_s16  ;;  %s826_s7 = int_to_ptr.vmem [resolvable:$true] %s173_s7 }
  0x20   : > { %s546_s8 = scalar_lea.hbm %s824_s30, 128  ;;  %p548_p10 = pneg %p830_p8 }
  0x21   : > { %p547_p9 = scmp.ne.s32.totalorder %s824_s30, %s546_s8  ;;  %s551_s11 = scalar_lea.hbm %s964_s2, 512 }
  0x22   : > { %p552_p12 = scmp.lt.u32.totalorder %s824_s30, %s964_s2  ;;  %p553_p0 = scmp.lt.u32.totalorder %s551_s11, %s546_s8 }
  0x23   : > { %p549_p11 = pnand %p548_p10, %p547_p9  ;;  %p555_p3 = scmp.lt.u32.totalorder %s546_s8, %s824_s30 }
  0x24   : > { %p554_p2 = por %p553_p0, %p552_p12 }
  0x25   : > { %p550_p13 = pneg %p549_p11 }
  0x26   : > { %p556_p7 = por %p555_p3, %p554_p2 }
  0x28   : > { %p557_p4 = pnand %p556_p7, %p550_p13 }
  0x2a   : > { %560 = shalt.err (!%p557_p4)
}
  0x2b   : > { %s561_s13 = scalar_lea.vmem %s826_s7, 128  ;;  %s701_s14 = smov [#allocation10]  }
  0x2c   : > { %p562_p9 = scmp.ne.s32.totalorder %s826_s7, %s561_s13  ;;  %s566_s16 = sshll.u32 %s701_s14, 4  ;;  %s567_s16 = int_to_ptr.vmem [resolvable:$false] %s566_s16 }
  0x2d   : > { %s568_s17 = scalar_lea.vmem %s567_s16, 256  ;;  %p569_p5 = scmp.lt.s32.totalorder %s826_s7, %s567_s16 }
  0x2e   : > { %p564_p11 = pnand %p562_p9, %p548_p10  ;;  %p570_p12 = scmp.lt.s32.totalorder %s568_s17, %s561_s13 }
  0x30   : > { %p565_p1 = pneg %p564_p11  ;;  %p571_p0 = por %p570_p12, %p569_p5 }
  0x32   : > { %p572_p2 = pnand %p571_p0, %p565_p1 }
  0x34   : > { %575 = shalt.err (!%p572_p2)
}
  0x35   : > { %477 = dma.hbm_to_vmem [thread:$0]  (!%p830_p8), %s824_s30, 128, %s826_s7, %s163_s29  }
  0x36   : > { %182 = sbr.rel (%p767_p6) target bundleno = 1236 (0x4d4), region = 32  ;;  %p975_p10 = scmp.eq.s32.totalorder (!%p767_p6), %s754_s22, 0 }
  0x3d   : > { %667 = dma.done.wait (%p975_p10), [#allocation9], 16   ;;  %p976_p13 = pmov %p975_p10 }
  0x3e   : > { %s188_s18 = sand.u32 1, %s690_s19   ;;  %p977_p1 = scmp.ne.s32.totalorder %s970_s23, 0 }
  0x3f   : > { %669 = vsyncadd (%p976_p13), [#allocation9], 4294967280  ;;  %s442_s26 = sshll.u32 %s188_s18, 3  ;;  %s189_s28 = scalar_lea.sflag [#allocation7], %s188_s18 }
  0x40   : > { %s192_s6 = scalar_lea.vmem [#allocation10], %s442_s26 }
  0x41   : > { %671 = dma.done.wait (%p977_p1), %s189_s28, 128  }
  0x42   : > { %673 = vsyncadd (%p977_p1), %s189_s28, 4294967168 }
  0x43   : > { %197 = sfence }
  0x44   : > { %s213_s24 = sld [smem:[#allocation6]]  ;;  %v215_v0 = vld [vmem:[%s192_s6] sm:$0xff]  ;;  %s873_s30 = sld [smem:[#allocation6 + $0x1]] }
  0x45   : > { %p978_p5 = scmp.ne.s32.totalorder %s754_s22, 0 }
  0x46   : > { %s702_s23 = smov (!%p978_p5), [#allocation2]   ;;  %s576_s8 = scalar_lea.hbm (!%p978_p5), %s963_s1, 256 }
  0x47   : > { %s238_s7 = sshll.u32 (!%p978_p5), %s702_s23, 4  ;;  %p577_p6 = scmp.ne.s32.totalorder (!%p978_p5), %s963_s1, %s576_s8  ;;  %s239_s7 = int_to_ptr.vmem [resolvable:$true] %s238_s7 }
  0x48   : > { %p580_p8 = scmp.lt.u32.totalorder (!%p978_p5), %s576_s8, %s963_s1 }
  0x4a   : > { %v216_v1 = vstv %s213_s24  ;;  %p582_p3 = pnand (!%p978_p5), %p580_p8, %p577_p6 }
  0x4b   : > { %v217_v2 = vmul.f32 %v216_v1, %v215_v0 }
  0x4d   : > { %218 = vmax.xlane.f32.xlu0 %v217_v2 }
  0xda   : > { %v219_v3 = vpop.xlane.xlu0 %218 }
  0xdb   : > { %v870_v4 = vsub.f32 %v217_v2, %v219_v3 }
  0xdd   : > { %v221_v5 = vmul.f32 1.442695, %v870_v4 }
  0xdf   : > { %521 = vpow2.f32 %v221_v5 }
  0xe9   : > { %v522_v6 = vpop.eup %521 }
  0xea   : > { %223 = vadd.xlane.f32.xlu0 %v522_v6 }
 0x177   : > { %v224_v7 = vpop.xlane.xlu0 %223 }
 0x178   : > { %523 = vlog2.f32 %v224_v7 }
 0x17d   : > { %230 = sbr.rel (%p978_p5) target bundleno = 863 (0x35f), region = 44 }
 0x182   : > { %v524_v8 = vpop.eup %523 }
 0x183   : > { %v875_v9 = vmul.f32 0.6931472, %v524_v8 }
 0x184   : > { %585 = shalt.err (!%p582_p3)  }
 0x185   : > { %s586_s12 = scalar_lea.vmem %s239_s7, 256  ;;  %p591_p4 = scmp.lt.s32.totalorder %s239_s7, %s239_s7 }
 0x186   : > { %p587_p7 = scmp.ne.s32.totalorder %s239_s7, %s586_s12  ;;  %p592_p9 = scmp.lt.s32.totalorder %s586_s12, %s586_s12 }
 0x188   : > { %p593_p11 = por %p592_p9, %p591_p4 }
 0x18a   : > { %p594_p12 = pnand %p593_p11, %p587_p7 }
 0x18c   : > { %597 = shalt.err (!%p594_p12)  }
 0x18d   : > { %241 = dma.hbm_to_vmem [thread:$0]  %s963_s1, 256, %s239_s7, [#allocation5] }
 0x18e   : > { %674 = dma.done.wait [#allocation5], 256 }
 0x18f   : > { %675 = vsyncadd [#allocation5], 4294967040  ;;  %v246_v10 = vld [vmem:[#allocation2 + $0x8] sm:$0xff]  ;;  %v445_v11 = vld [vmem:[%s965_s3] ss:$0 sm:$0xff]  ;;  %v256_v12 = vstv %s873_s30  ;;  %vm292_vm0 = vcmask 7168  }
 0x190   : > { %v245_v13 = vld [vmem:[#allocation2] sm:$0xff]  ;;  %v255_v14 = vsub.f32 %v246_v10, %v445_v11 }
 0x191   : > { %v254_v15 = vsub.f32 %v245_v13, %v445_v11 }
 0x192   : > { %v258_v16 = vmul.f32 %v256_v12, %v255_v14 }
 0x193   : > { %v257_v17 = vmul.f32 %v256_v12, %v254_v15 }
 0x194   : > { %261 = vmax.xlane.f32.xlu0 %v258_v16 }
 0x198   : > { %259 = vmax.xlane.f32.xlu0 %v257_v17 }
 0x221   : > { %v262_v18 = vpop.xlane.xlu0 %261 }
 0x222   : > { %v264_v19 = vsub.f32 %v258_v16, %v262_v18 }
 0x224   : > { %v267_v20 = vmul.f32 1.442695, %v264_v19 }
 0x225   : > { %v260_v21 = vpop.xlane.xlu0 %259 }
 0x226   : > { %525 = vpow2.f32 %v267_v20  ;;  %v263_v22 = vsub.f32 %v257_v17, %v260_v21 }
 0x228   : > { %v265_v23 = vmul.f32 1.442695, %v263_v22 }
 0x22a   : > { %527 = vpow2.f32 %v265_v23 }
 0x230   : > { %v526_v24 = vpop.eup %525 }
 0x231   : > { %271 = vadd.xlane.f32.xlu1 %v526_v24 }
 0x234   : > { %v528_v25 = vpop.eup %527 }
 0x235   : > { %269 = vadd.xlane.f32.xlu1 %v528_v25 }
 0x2be   : > { %v272_v26 = vpop.xlane.xlu1 %271 }
 0x2bf   : > { %529 = vrcp.f32 %v272_v26 }
 0x2c2   : > { %v270_v27 = vpop.xlane.xlu1 %269 }
 0x2c3   : > { %531 = vrcp.f32 %v270_v27 }
 0x2c9   : > { %v530_v28 = vpop.eup %529 }
 0x2ca   : > { %v276_v29 = vmul.f32 %v530_v28, %v526_v24 }
 0x2cc   : > { %278 = vst [vmem:[#allocation2 + $0x8] sm:$0xff] %v276_v29  ;;  %v288_v30 = vmul.f32 %v276_v29, %v870_v4 }
 0x2cd   : > { %v532_v31 = vpop.eup %531 }
 0x2ce   : > { %v275_v32 = vmul.f32 %v532_v31, %v528_v25  ;;  %289 = vadd.xlane.f32.xlu0 %v288_v30 }
 0x2d0   : > { %277 = vst [vmem:[#allocation2] sm:$0xff] %v275_v32  ;;  %v279_v33 = vadd.f32 %v276_v29, %v275_v32 }
 0x2d2   : > { %280 = vst [vmem:[#allocation3] sm:$0xff] %v279_v33  ;;  %v281_v34 = vrot.slane %v279_v33, 4 }
 0x2d4   : > { %v282_v35 = vadd.f32 %v281_v34, %v279_v33 }
 0x2d6   : > { %v283_v36 = vrot.slane %v282_v35, 2 }
 0x2d8   : > { %v284_v37 = vadd.f32 %v283_v36, %v282_v35 }
 0x2da   : > { %v285_v38 = vrot.slane %v284_v37, 1 }
 0x2dc   : > { %v286_v39 = vadd.f32 %v285_v38, %v284_v37 }
 0x2de   : > { %287 = vst [vmem:[#allocation12] sm:$0x1] %v286_v39 }
 0x35b   : > { %v290_v40 = vpop.xlane.xlu0 %289 }
 0x35c   : > { %v291_v41 = vsub.f32 %v875_v9, %v290_v40 }
 0x35e   : > { %293 = vst.msk [vmem:[#allocation4] sm:$0xff] %vm292_vm0, %v291_v41 }
 0x35f PF: > { %p446_p0 = scmp.ne.s32.totalorder %s754_s22, 1 }
 0x360   : > { %v298_v42 = vld [vmem:[#allocation2] sm:$0xff] (!%p446_p0)  ;;  %vm305_vm1 = vcmask (!%p446_p0), 7168  }
 0x361   : > { %297 = sbr.rel (%p446_p0) target bundleno = 1014 (0x3f6), region = 52  ;;  %v299_v43 = vmul.f32 (!%p446_p0), %v298_v42, %v870_v4 }
 0x363   : > { %300 = vadd.xlane.f32.xlu0 (!%p446_p0), %v299_v43 }
 0x365   : > { %v302_v45 = vld [vmem:[#allocation4] sm:$0xff] (!%p446_p0) }
 0x3f0   : > { %v301_v44 = vpop.xlane.xlu0 %300 }
 0x3f1   : > { %v303_v46 = vsub.f32 %v875_v9, %v301_v44 }
 0x3f3   : > { %v304_v47 = vadd.f32 %v303_v46, %v302_v45 }
 0x3f5   : > { %306 = vst.msk [vmem:[#allocation4] sm:$0xff] %vm305_vm1, %v304_v47 }
 0x3f6 PF: > { %p447_p2 = scmp.lt.s32.totalorder %s754_s22, 2 }
 0x3f7   : > { %v311_v48 = vld [vmem:[#allocation3] sm:$0xff] (!%p447_p2)  ;;  %v316_v50 = vmul.f32 (!%p447_p2), 2.0, %v875_v9  ;;  %vm319_vm2 = vcmask (!%p447_p2), 7168  }
 0x3f8   : > { %310 = sbr.rel (%p447_p2) target bundleno = 1165 (0x48d), region = 56  ;;  %v312_v49 = vmul.f32 (!%p447_p2), %v311_v48, %v870_v4 }
 0x3fa   : > { %313 = vadd.xlane.f32.xlu0 (!%p447_p2), %v312_v49 }
 0x3fc   : > { %v315_v52 = vld [vmem:[#allocation4] sm:$0xff] (!%p447_p2) }
 0x487   : > { %v314_v51 = vpop.xlane.xlu0 %313 }
 0x488   : > { %v317_v53 = vsub.f32 %v316_v50, %v314_v51 }
 0x48a   : > { %v318_v54 = vadd.f32 %v317_v53, %v315_v52 }
 0x48c   : > { %320 = vst.msk [vmem:[#allocation4] sm:$0xff] %vm319_vm2, %v318_v54 }
 0x48d PF: > { %p448_p10 = scmp.ne.s32.totalorder %s754_s22, 3 }
 0x48e   : > { %vm326_vm3 = vcmask (!%p448_p10), 7168   ;;  %vm335_vm4 = vcmask (!%p448_p10), 0  }
 0x48f   : > { %324 = sbr.rel (%p448_p10) target bundleno = 1188 (0x4a4), region = 60 }
 0x493   : > { %v325_v55 = vld [vmem:[#allocation4] sm:$0xff] (!%p448_p10) }
 0x494   : > { %v327_v56 = vsel (!%p448_p10), %vm326_vm3, %v325_v55, 0.0 }
 0x495   : > { %v328_v57 = vrot.slane (!%p448_p10), %v327_v56, 4 }
 0x497   : > { %v329_v58 = vadd.f32 %v328_v57, %v327_v56 }
 0x499   : > { %v330_v59 = vrot.slane %v329_v58, 2 }
 0x49b   : > { %v331_v60 = vadd.f32 %v330_v59, %v329_v58 }
 0x49d   : > { %v332_v61 = vrot.slane %v331_v60, 1 }
 0x49f   : > { %v333_v62 = vadd.f32 %v332_v61, %v331_v60 }
 0x4a1   : > { %v334_v63 = vmul.f32 0.020833334, %v333_v62 }
 0x4a3   : > { %336 = vst.msk [vmem:[#allocation11] sm:$0x1] %vm335_vm4, %v334_v63 }
 0x4a4 PF: > { %p481_p13 = scmp.eq.s32.totalorder %s754_s22, 3  ;;  %s703_s18 = smov [#allocation11]  }
 0x4a5   : > { %s344_s26 = sshll.u32 %s703_s18, 4  ;;  %s704_s28 = smov [#allocation12]   ;;  %s345_s26 = int_to_ptr.vmem [resolvable:$true] %s344_s26 }
 0x4a6   : > { %s355_s6 = sshll.u32 %s704_s28, 4  ;;  %s598_s24 = scalar_lea.vmem %s345_s26, 16  ;;  %s356_s6 = int_to_ptr.vmem [resolvable:$true] %s355_s6 }
 0x4a7   : > { %p599_p1 = scmp.ne.s32.totalorder %s345_s26, %s598_s24  ;;  %s604_s30 = scalar_lea.vmem %s345_s26, 32 }
 0x4a8   : > { %p605_p8 = scmp.lt.s32.totalorder %s345_s26, %s345_s26  ;;  %p606_p3 = scmp.lt.s32.totalorder %s604_s30, %s598_s24 }
 0x4a9   : > { %p600_p5 = pnand %p599_p1, %p481_p13 }
 0x4aa   : > { %p607_p7 = por %p606_p3, %p605_p8 }
 0x4ab   : > { %p601_p6 = pneg %p600_p5 }
 0x4ad   : > { %p608_p4 = pnand %p607_p7, %p601_p6 }
 0x4af   : > { %611 = shalt.err (!%p608_p4)
}
 0x4b0   : > { %s612_s27 = scalar_lea.hbm %s966_s4, 16 }
 0x4b1   : > { %p613_p9 = scmp.ne.s32.totalorder %s966_s4, %s612_s27  ;;  %p618_p0 = scmp.lt.u32.totalorder %s612_s27, %s966_s4 }
 0x4b3   : > { %p614_p11 = pnand %p613_p9, %p481_p13 }
 0x4b5   : > { %p615_p12 = pneg %p614_p11 }
 0x4b7   : > { %p620_p2 = pnand %p618_p0, %p615_p12 }
 0x4b9   : > { %623 = shalt.err (!%p620_p2)
}
 0x4ba   : > { %463 = dma.vmem_to_hbm [thread:$0]  (%p481_p13), %s345_s26, 16, %s966_s4, [#allocation8]  }
 0x4bb   : > { %s624_s12 = scalar_lea.vmem %s356_s6, 16  ;;  %s630_s13 = scalar_lea.vmem %s356_s6, 32 }
 0x4bc   : > { %p625_p10 = scmp.ne.s32.totalorder %s356_s6, %s624_s12  ;;  %p631_p6 = scmp.lt.s32.totalorder %s356_s6, %s356_s6 }
 0x4bd   : > { %p632_p8 = scmp.lt.s32.totalorder %s630_s13, %s624_s12 }
 0x4be   : > { %p626_p1 = pnand %p625_p10, %p481_p13 }
 0x4bf   : > { %p633_p3 = por %p632_p8, %p631_p6 }
 0x4c0   : > { %p627_p5 = pneg %p626_p1 }
 0x4c2   : > { %p634_p7 = pnand %p633_p3, %p627_p5 }
 0x4c4   : > { %637 = shalt.err (!%p634_p7)
}
 0x4c5   : > { %s638_s17 = scalar_lea.hbm %s967_s5, 16 }
 0x4c6   : > { %p639_p4 = scmp.ne.s32.totalorder %s967_s5, %s638_s17  ;;  %p644_p12 = scmp.lt.u32.totalorder %s638_s17, %s967_s5 }
 0x4c8   : > { %p640_p9 = pnand %p639_p4, %p481_p13 }
 0x4ca   : > { %p641_p11 = pneg %p640_p9 }
 0x4cc   : > { %p646_p0 = pnand %p644_p12, %p641_p11 }
 0x4ce   : > { %649 = shalt.err (!%p646_p0)
}
 0x4cf   : > { %465 = dma.vmem_to_hbm [thread:$0]  (%p481_p13), %s356_s6, 16, %s967_s5, [#allocation13]  }
 0x4d0   : > { %677 = dma.done.wait (%p481_p13), [#allocation8], 16  }
 0x4d1   : > { %679 = vsyncadd (%p481_p13), [#allocation8], 4294967280 }
 0x4d2   : > { %681 = dma.done.wait (%p481_p13), [#allocation13], 16  }
 0x4d3   : > { %683 = vsyncadd (%p481_p13), [#allocation13], 4294967280 }
 0x4d4 PF: > { %p19_p2 = scmp.ge.s32.totalorder %s772_s25, 6   ;;  %s979_s18 = smov %s690_s19 }
 0x4d5   : > { %s980_s19 = smov %s694_s20  ;;  %s981_s20 = smov %s812_s15 }
 0x4d6   : > { %s982_s21 = smov %s772_s25  ;;  %21 = sbr.rel (!%p19_p2) target bundleno = 6 (0x6), region = 102 }
 0x4dd   :  { %372 = vsyncpa [#allocation7], 1 }
 0x4de   :  { %374 = vsyncpa [#allocation7 + $0x1], 1 }
 0x4df   :  { %375 = vsyncpa [#allocation8], 1 }
 0x4e0   :  { %377 = vsyncpa [#allocation8 + $0x1], 1 }
 0x4e1   :  { %378 = vsyncpa [#allocation13], 1 }
 0x4e2   :  { %379 = vsyncpa [#allocation9], 1 }
 0x4e3   :  { %381 = vsyncpa [#allocation9 + $0x1], 1 }
 0x4e4   :  { %382 = vsyncmov [#allocation5] }
 0x4e7   :  { %s383_s22 = vpop.sfrf %382 }
 0x4e8   :  { %p455_p13 = scmp.ne.s32.totalorder %s383_s22, 0 }
 0x4ea   :  { %387 = shalt.err (%p455_p13)  }

</bundles_post_ra>
